<compile_context>
chip_gen: v7x
topology: tpu7x:2x2x1
jax: 0.10.0
libtpu: 0.0.40
codegen_flags: <defaults>
</compile_context>

<pallas_src>
import functools

import jax
import jax.numpy as jnp
import numpy as np
from jax.experimental import pallas as pl
from jax.experimental.pallas import tpu as pltpu


def _round_up(x, m):
    return (x + m - 1) // m * m


def _cdiv(a, b):
    return (a + b - 1) // b


def _sine_layer_kernel(x_ref, w_ref, b_ref, o_ref, *, apply_sin, compute_dtype):
    # x tile cast in-kernel (no separate HBM cast pass); w is already [K, N] and
    # already scaled by omega (sin path), so the MXU output only needs +bias (+sin).
    x = x_ref[...].astype(compute_dtype)
    y = jnp.dot(x, w_ref[...], preferred_element_type=jnp.float32)
    y = y + b_ref[...]                     # f32 bias broadcast [1, out_p] over rows
    if apply_sin:
        y = jnp.sin(y)                     # omega folded into W/b -> no extra VALU mul
    o_ref[...] = y.astype(o_ref.dtype)


def sine_layer(
    x,
    weight,
    bias,
    *,
    omega=30.0,
    is_last=False,
    block_rows=1024,
    compute_dtype=jnp.bfloat16,
    out_dtype=None,
    keep_padded=False,
):
    """Pallas implementation of SineLayer.forward.

    x:      [N, in_features]               float32 (or bf16)
    weight: [out_features, in_features]    PyTorch nn.Linear convention
    bias:   [out_features]

    Returns sin(omega * (x @ W.T + b)), or x @ W.T + b when is_last.
    """
    n, in_features = x.shape
    out_features, in_w = weight.shape
    assert in_w == in_features, (in_w, in_features)
    if out_dtype is None:
        out_dtype = x.dtype

    apply_sin = not is_last

    # --- Weight/bias prep (all tiny tensors; wrapper cost is negligible). -------
    #  1) transpose once to MXU-native [K, N]
    #  2) fold omega into W and b (sin path only)
    #  3) pad out dim to a multiple of 128 for lane-dense output stores
    #  4) cast W to the MXU operand dtype (bf16 by default; f32 accumulate)
    w_t = weight.T                                          # [in, out]
    b_f32 = bias.astype(jnp.float32)
    if apply_sin:
        w_t = w_t * jnp.asarray(omega, w_t.dtype)
        b_f32 = b_f32 * jnp.float32(omega)
    out_p = _round_up(out_features, 128)
    if out_p != out_features:
        w_t = jnp.pad(w_t, ((0, 0), (0, out_p - out_features)))
        b_f32 = jnp.pad(b_f32, (0, out_p - out_features))
    w_t = w_t.astype(compute_dtype)
    b2 = b_f32.reshape(1, out_p)

    # --- Row tiling: NO wrapper-side pad of x; ragged last tile handled by ------
    # Pallas OOB masking. Tile must be a multiple of 8 sublanes.
    tile_n = min(_round_up(int(block_rows), 8), _round_up(n, 8))
    # Feed both TensorCores on v7x: prefer >= 2 row tiles when enough rows exist.
    if _cdiv(n, tile_n) < 2 and n > 8:
        tile_n = _round_up(_cdiv(n, 2), 8)

    # --- Keep the double-buffered footprint within v7x's 64 MiB VMEM / TC. ------
    x_item = x.dtype.itemsize
    w_item = jnp.dtype(compute_dtype).itemsize
    o_item = jnp.dtype(out_dtype).itemsize

    def footprint(t):
        return (2 * t * in_features * x_item          # x row tiles (double-buffered)
                + 2 * in_features * out_p * w_item    # resident weight buffers
                + 2 * out_p * 4                       # bias
                + 2 * t * out_p * o_item)             # out row tiles (double-buffered)

    VMEM_BUDGET = 48 * 1024 * 1024
    while tile_n > 8 and footprint(tile_n) > VMEM_BUDGET:
        tile_n = _round_up(tile_n // 2, 8)

    grid = (_cdiv(n, tile_n),)
    vmem_limit = int(min(64 * 1024 * 1024,
                         max(32 * 1024 * 1024, 2 * footprint(tile_n))))

    kernel = functools.partial(
        _sine_layer_kernel, apply_sin=apply_sin, compute_dtype=compute_dtype)

    # sin lowers to a VPU polynomial (not EUP): fold ~25 flops/element into flops.
    cost = pl.CostEstimate(
        flops=2 * n * in_features * out_p + (0 if is_last else 25 * n * out_p),
        transcendentals=0,
        bytes_accessed=(x.size * x_item + w_t.size * w_item + b2.size * 4
                        + n * out_p * o_item),
    )

    out = pl.pallas_call(
        kernel,
        out_shape=jax.ShapeDtypeStruct((n, out_p), out_dtype),
        grid=grid,
        in_specs=[
            # x: streamed row tiles (auto double-buffered pipeline).
            pl.BlockSpec((tile_n, in_features), lambda i: (i, 0)),
            # weight / bias: constant block index -> DMA'd once, stay resident.
            pl.BlockSpec((in_features, out_p), lambda i: (0, 0)),
            pl.BlockSpec((1, out_p), lambda i: (0, 0)),
        ],
        out_specs=pl.BlockSpec((tile_n, out_p), lambda i: (i, 0)),
        compiler_params=pltpu.CompilerParams(
            dimension_semantics=("parallel",),  # shard row tiles across TCs (v7x)
            vmem_limit_bytes=vmem_limit,
        ),
        cost_estimate=cost,
    )(x, w_t, b2)

    if not keep_padded and out_p != out_features:
        out = out[:, :out_features]
    return out


def init_sine_layer_params(key, in_features, out_features, *, is_first=False, omega=30.0):
    """Deterministic init matching the PyTorch module's __init__."""
    if is_first:
        bound = 1.0 / in_features
    else:
        bound = np.sqrt(6.0 / in_features) / omega
    weight = jax.random.uniform(
        key, (out_features, in_features), jnp.float32, minval=-bound, maxval=bound
    )
    bias = jnp.zeros((out_features,), jnp.float32)
    return weight, bias


if __name__ == "__main__":
    key = jax.random.PRNGKey(0)
    k_x, k_w, k_x2, k_w2 = jax.random.split(key, 4)

    OMEGA = 30.0

    # ---- Test 1: small shapes, sin path, f32 MXU operands (tight check). ------
    N, IN_F, OUT_F = 8, 32, 32
    x = jax.random.normal(k_x, (N, IN_F), jnp.float32)
    weight, bias = init_sine_layer_params(k_w, IN_F, OUT_F, is_first=True, omega=OMEGA)

    out = jax.block_until_ready(
        sine_layer(x, weight, bias, omega=OMEGA, is_last=False,
                   compute_dtype=jnp.float32))
    ref = jnp.sin(OMEGA * (x @ weight.T + bias))
    np.testing.assert_allclose(np.asarray(out), np.asarray(ref), rtol=1e-4, atol=1e-4)

    # ---- Test 2: is_last=True path (plain linear, no omega fold), f32. --------
    out_last = jax.block_until_ready(
        sine_layer(x, weight, bias, omega=OMEGA, is_last=True,
                   compute_dtype=jnp.float32))
    ref_last = x @ weight.T + bias
    np.testing.assert_allclose(np.asarray(out_last), np.asarray(ref_last),
                               rtol=1e-5, atol=1e-5)

    # ---- Test 3: uneven N / out_features -> ragged last row tile + out pad. ---
    N2, IN2, OUT2 = 300, 64, 200
    x2 = jax.random.normal(k_x2, (N2, IN2), jnp.float32)
    w2, b2v = init_sine_layer_params(k_w2, IN2, OUT2, is_first=False, omega=OMEGA)

    out2 = jax.block_until_ready(
        sine_layer(x2, w2, b2v, omega=OMEGA, is_last=False, block_rows=128,
                   compute_dtype=jnp.float32))
    ref2 = jnp.sin(OMEGA * (x2 @ w2.T + b2v))
    np.testing.assert_allclose(np.asarray(out2), np.asarray(ref2), rtol=1e-4, atol=1e-4)

    # ---- Test 4: default path (bf16 MXU operands, f32 accumulate + sin tail). -
    out_bf16 = jax.block_until_ready(
        sine_layer(x2, w2, b2v, omega=OMEGA, is_last=False, block_rows=128))
    wq = (OMEGA * w2.T).astype(jnp.bfloat16)
    ref_bf16 = jnp.sin(
        jnp.dot(x2.astype(jnp.bfloat16), wq, preferred_element_type=jnp.float32)
        + OMEGA * b2v)
    np.testing.assert_allclose(np.asarray(out_bf16), np.asarray(ref_bf16),
                               rtol=2e-2, atol=2e-2)

    print("KERNEL_OK")
</pallas_src>

<mosaic_0001>
module attributes {stable_mosaic.version = 11 : i64} {
  func.func @_sine_layer_kernel(%arg0: i32, %arg1: memref<8x32xf32, #tpu.memory_space<vmem>>, %arg2: memref<32x128xf32, #tpu.memory_space<vmem>>, %arg3: memref<1x128xf32, #tpu.memory_space<vmem>>, %arg4: memref<8x128xf32, #tpu.memory_space<vmem>>) attributes {dimension_semantics = [#tpu.dimension_semantics<parallel>], iteration_bounds = array<i64: 1>, scalar_prefetch = 0 : i64, scratch_operands = 0 : i64, tpu.core_type = #tpu.core_type<tc>, window_params = [{transform_indices = @transform_0, window_bounds = array<i64: 8, 32>}, {pipeline_mode = #tpu.pipeline_mode<synchronous>, transform_indices = @transform_1, window_bounds = array<i64: 32, 128>}, {pipeline_mode = #tpu.pipeline_mode<synchronous>, transform_indices = @transform_2, window_bounds = array<i64: 1, 128>}, {transform_indices = @transform_3, window_bounds = array<i64: 8, 128>}]} {
    %c0 = arith.constant 0 : index
    %c0_0 = arith.constant 0 : index
    %0 = vector.load %arg1[%c0, %c0_0] : memref<8x32xf32, #tpu.memory_space<vmem>>, vector<8x32xf32>
    %c0_1 = arith.constant 0 : index
    %c0_2 = arith.constant 0 : index
    %1 = vector.load %arg2[%c0_1, %c0_2] : memref<32x128xf32, #tpu.memory_space<vmem>>, vector<32x128xf32>
    %cst = arith.constant dense<0.000000e+00> : vector<8x128xf32>
    %2 = tpu.matmul %0, %1, %cst {dimension_numbers = #tpu.dot_dimension_numbers<[1], [0], [0], [1], [0, 0, 1, 1], [], []>} : vector<8x32xf32>, vector<32x128xf32>, vector<8x128xf32> -> vector<8x128xf32>
    %c0_3 = arith.constant 0 : index
    %c0_4 = arith.constant 0 : index
    %3 = vector.load %arg3[%c0_3, %c0_4] : memref<1x128xf32, #tpu.memory_space<vmem>>, vector<1x128xf32>
    %4 = vector.broadcast %3 : vector<1x128xf32> to vector<8x128xf32>
    %5 = arith.addf %2, %4 : vector<8x128xf32>
    %6 = math.sin %5 : vector<8x128xf32>
    %c0_5 = arith.constant 0 : index
    %c0_6 = arith.constant 0 : index
    %7 = vector.load %arg4[%c0_5, %c0_6] : memref<8x128xf32, #tpu.memory_space<vmem>>, vector<8x128xf32>
    tpu.vector_store %arg4[%c0_5, %c0_6], %6 {strides = array<i32>} : memref<8x128xf32, #tpu.memory_space<vmem>>, vector<8x128xf32>,
    return
  }
  func.func @transform_0(%arg0: i32) -> (i32, i32) {
    %c0_i32 = arith.constant 0 : i32
    %c0_i32_0 = arith.constant 0 : i32
    return %arg0, %c0_i32 : i32, i32
  }
  func.func @transform_1(%arg0: i32) -> (i32, i32) {
    %c0_i32 = arith.constant 0 : i32
    %c0_i32_0 = arith.constant 0 : i32
    %c0_i32_1 = arith.constant 0 : i32
    return %c0_i32, %c0_i32_0 : i32, i32
  }
  func.func @transform_2(%arg0: i32) -> (i32, i32) {
    %c0_i32 = arith.constant 0 : i32
    %c0_i32_0 = arith.constant 0 : i32
    %c0_i32_1 = arith.constant 0 : i32
    return %c0_i32, %c0_i32_0 : i32, i32
  }
  func.func @transform_3(%arg0: i32) -> (i32, i32) {
    %c0_i32 = arith.constant 0 : i32
    %c0_i32_0 = arith.constant 0 : i32
    return %arg0, %c0_i32 : i32, i32
  }
}

</mosaic_0001>

<bundles_post_ra>
// kernel: tpu_custom_call.1
= control target key start
LH: loop header
LB: loop body
LE: loop exit
PB: predicated region body
PF: predicated region fallthrough
CT: control target
= control target key end

     0   :  { %8 = vsyncpa [#allocation3], 0  ;;  %s471_s0 = inlined_call_operand.hbm [shape: f32[8,32], index: 0, kind: input, shape index: {}]   ;;  %s472_s1 = inlined_call_operand.hbm [shape: f32[32,128], index: 1, kind: input, shape index: {}]   ;;  %s473_s2 = inlined_call_operand.vmem [shape: f32[1,128], index: 2, kind: input, shape index: {}]   ;;  %s474_s3 = inlined_call_operand.hbm [shape: f32[8,128], index: 3, kind: output, shape index: {}]  }
   0x1   :  { %9 = vsyncpa [#allocation6], 0 }
   0x2   :  { %10 = vsyncpa [#allocation4], 0  ;;  %s370_s12 = smov [#allocation2]   ;;  %s371_s14 = smov [#allocation5]  }
   0x3   :  { %s17_s13 = sshll.u32 %s370_s12, 4  ;;  %s26_s15 = sshll.u32 %s371_s14, 4  ;;  %s18_s13 = int_to_ptr.vmem [resolvable:$true] %s17_s13  ;;  %s404_s15 = int_to_ptr.vmem [resolvable:$true] %s26_s15 }
   0x4   :  { %s298_s18 = scalar_lea.hbm %s471_s0, 128 }
   0x5   :  { %p299_p0 = scmp.ne.s32.totalorder %s471_s0, %s298_s18  ;;  %p302_p1 = scmp.lt.u32.totalorder %s298_s18, %s471_s0 }
   0x7   :  { %p304_p2 = pnand %p302_p1, %p299_p0 }
   0x9   :  { %307 = shalt.err (!%p304_p2)
}
   0xa   :  { %s308_s23 = scalar_lea.vmem %s18_s13, 128  ;;  %p313_p4 = scmp.lt.s32.totalorder %s18_s13, %s18_s13 }
   0xb   :  { %p309_p3 = scmp.ne.s32.totalorder %s18_s13, %s308_s23  ;;  %p314_p5 = scmp.lt.s32.totalorder %s308_s23, %s308_s23 }
   0xd   :  { %p315_p6 = por %p314_p5, %p313_p4 }
   0xf   :  { %p316_p7 = pnand %p315_p6, %p309_p3 }
  0x11   :  { %319 = shalt.err (!%p316_p7)
}
  0x12   :  { %20 = dma.hbm_to_vmem [thread:$0]  %s471_s0, 128, %s18_s13, [#allocation3]  }
  0x13   :  { %s320_s28 = scalar_lea.hbm %s472_s1, 512 }
  0x14   :  { %p321_p8 = scmp.ne.s32.totalorder %s472_s1, %s320_s28  ;;  %p324_p9 = scmp.lt.u32.totalorder %s320_s28, %s472_s1 }
  0x16   :  { %p326_p10 = pnand %p324_p9, %p321_p8 }
  0x18   :  { %329 = shalt.err (!%p326_p10)
}
  0x19   :  { %s330_s6 = scalar_lea.vmem %s404_s15, 512  ;;  %p335_p12 = scmp.lt.s32.totalorder %s404_s15, %s404_s15 }
  0x1a   :  { %p331_p11 = scmp.ne.s32.totalorder %s404_s15, %s330_s6  ;;  %p336_p13 = scmp.lt.s32.totalorder %s330_s6, %s330_s6 }
  0x1c   :  { %p337_p0 = por %p336_p13, %p335_p12 }
  0x1e   :  { %p338_p1 = pnand %p337_p0, %p331_p11 }
  0x20   :  { %341 = shalt.err (!%p338_p1)
}
  0x21   :  { %s372_s0 = smov 128   ;;  %s373_s7 = smov 8  }
  0x22   :  { %32 = dma.hbm_to_vmem [thread:$0]  %s472_s1, 512, %s404_s15, [#allocation6], %s372_s0, %s372_s0, %s373_s7  }
  0x23   :  { %364 = dma.done.wait [#allocation3], 128  }
  0x24   :  { %365 = vsyncadd [#allocation3], 4294967168 }
  0x25   :  { %366 = dma.done.wait [#allocation6], 512  }
  0x26   :  { %367 = vsyncadd [#allocation6], 4294966784  ;;  %v374_v0 = vmov 0.0|0.0   ;;  %vm375_vm0 = vmmov 0   ;;  %v376_v1 = vmov 0.0   ;;  %v42_v2 = vld [vmem:[#allocation5] sm:$0xff] }
  0x27   :  { %270 = vmatprep.subr.bf16.mxu0 %v374_v0  ;;  %267 = vmatprep.mubr.msk.f32.mxu0 %vm375_vm0, %v376_v1  ;;  %v43_v3 = vld [vmem:[#allocation5 + $0x8] sm:$0xff]  ;;  %v44_v4 = vld [vmem:[#allocation5 + $0x10] sm:$0xff]  ;;  %v45_v6 = vld [vmem:[#allocation5 + $0x18] sm:$0xff]  ;;  %vm53_vm1 = vcmask 261120   ;;  %v377_v23 = vmov 683565275  }
  0x28   :  { %v271_v5 = vpack.c.bf16 %v43_v3, %v42_v2  ;;  %v274_v7 = vpack.c.bf16 %v45_v6, %v44_v4  ;;  %v41_v8 = vld [vmem:[#allocation2] sm:$0xff]  ;;  %v378_v25 = vmov 2475754826   ;;  %v379_v28 = vmov 2131351028  }
  0x29   :  { %v248_v9 = vld [vmem:[%s473_s2] ss:$0 sm:$0xff]  ;;  %v380_v31 = vmov 2102212464   ;;  %v381_v34 = vmov 920167782  }
  0x2a   :  { %272 = vmatpush3.bf16.msra.mxu0 %v271_v5  ;;  %v382_v37 = vmov 1326507024   ;;  %s383_s2 = smov [#allocation7]  }
  0x2b   :  { %273 = vmatprep.subr.bf16.mxu0 %v374_v0  ;;  %s238_s11 = sshll.u32 %s383_s2, 4  ;;  %s239_s11 = int_to_ptr.vmem [resolvable:$true] %s238_s11 }
  0x2c   :  { %s342_s12 = scalar_lea.vmem %s239_s11, 128  ;;  %p347_p3 = scmp.lt.s32.totalorder %s239_s11, %s239_s11 }
  0x2d   :  { %p343_p2 = scmp.ne.s32.totalorder %s239_s11, %s342_s12  ;;  %p348_p4 = scmp.lt.s32.totalorder %s342_s12, %s342_s12 }
  0x2e   :  { %275 = vmatpush3.bf16.msra.mxu0 %v274_v7 }
  0x2f   :  { %p349_p5 = por %p348_p4, %p347_p3 }
  0x31   :  { %268 = vmatmul.mubr.msk.f32.vlgmr.msra.gmra.mrb[0].mxu0 %vm53_vm1, %v41_v8  ;;  %p350_p6 = pnand %p349_p5, %p343_p2 }
 0x104   :  { %v123_v10 = vpop.f32.mrb[0].mxu0 }
 0x105   :  { %v438_v11 = vadd.f32 %v248_v9, %v123_v10  ;;  %v269_v12 = vpop.f32.mrb[1].mxu0 }
 0x107   :  { %v130_v13 = vand.u32 2139095040, %v438_v11  ;;  %v127_v17 = vand.u32 2147483647, %v438_v11  ;;  %vm129_vm9 = vcmp.lt.s32.totalorder %v438_v11, 0  ;;  %vm219_vm14 = vweird.f32 %v438_v11 }
 0x109   :  { %v131_v14 = vshrl.u32 %v130_v13, 23  ;;  %v134_v20 = vand.u32 8388607, %v127_v17  ;;  %vm128_vm10 = vcmp.le.f32.partialorder %v127_v17, 0.7853982 }
 0x10b   :  { %v250_v15 = vadd.s32 4294967169, %v131_v14  ;;  %v135_v39 = vor.u32 8388608, %v134_v20 }
 0x10d   :  { %v137_v16 = vadd.s32 1, %v250_v15  ;;  %v175_v53 = vshll.u32 %v135_v39, 8 }
 0x10f   :  { %vm138_vm2 = vcmp.gt.s32.totalorder %v137_v16, 0 }
 0x110   :  { %v139_v18 = vsel %vm138_vm2, %v137_v16, 0 }
 0x111   :  { %v141_v19 = vand.u32 31, %v139_v18  ;;  %v140_v22 = vshrl.u32 %v139_v18, 5 }
 0x113   :  { %v142_v21 = vsub.s32 32, %v141_v19  ;;  %v144_v24 = vshll.u32 %v377_v23, %v141_v19  ;;  %v147_v26 = vshll.u32 %v378_v25, %v141_v19  ;;  %v150_v30 = vshll.u32 %v379_v28, %v141_v19 }
 0x114   :  { %v153_v33 = vshll.u32 %v380_v31, %v141_v19  ;;  %v156_v36 = vshll.u32 %v381_v34, %v141_v19  ;;  %vm159_vm3 = vcmp.lt.s32.totalorder %v140_v22, 1  ;;  %vm162_vm4 = vcmp.lt.s32.totalorder %v140_v22, 4 }
 0x115   :  { %v145_v27 = vshrl.u32 %v378_v25, %v142_v21  ;;  %v148_v29 = vshrl.u32 %v379_v28, %v142_v21  ;;  %v151_v32 = vshrl.u32 %v380_v31, %v142_v21  ;;  %v154_v35 = vshrl.u32 %v381_v34, %v142_v21 }
 0x116   :  { %v157_v38 = vshrl.u32 %v382_v37, %v142_v21  ;;  %v143_v48 = vshrl.u32 %v377_v23, %v142_v21  ;;  %vm161_vm5 = vcmp.lt.s32.totalorder %v140_v22, 3  ;;  %vm160_vm6 = vcmp.lt.s32.totalorder %v140_v22, 2 }
 0x117   :  { %v146_v40 = vor.u32 %v145_v27, %v144_v24  ;;  %v149_v41 = vor.u32 %v148_v29, %v147_v26  ;;  %v152_v42 = vor.u32 %v151_v32, %v150_v30  ;;  %v155_v43 = vor.u32 %v154_v35, %v153_v33 }
 0x118   :  { %v158_v44 = vor.u32 %v157_v38, %v156_v36 }
 0x119   :  { %v164_v45 = vsel %vm162_vm4, %v152_v42, 2102212464  ;;  %v167_v46 = vsel %vm159_vm3, %v146_v40, %v149_v41  ;;  %v171_v47 = vsel %vm159_vm3, %v149_v41, %v152_v42  ;;  %v168_v49 = vsel %vm162_vm4, %v155_v43, 920167782 }
 0x11a   :  { %v172_v50 = vsel %vm162_vm4, %v158_v44, 1326507024  ;;  %v169_v51 = vsel %vm161_vm5, %v152_v42, %v168_v49  ;;  %v163_v54 = vsel %vm159_vm3, %v143_v48, %v146_v40  ;;  %v165_v55 = vsel %vm161_vm5, %v149_v41, %v164_v45 }
 0x11b   :  { %v173_v52 = vsel %vm161_vm5, %v155_v43, %v172_v50  ;;  %v170_v56 = vsel %vm160_vm6, %v167_v46, %v169_v51  ;;  %v166_v62 = vsel %vm160_vm6, %v163_v54, %v165_v55 }
 0x11c   :  { %v174_v57 = vsel %vm160_vm6, %v171_v47, %v173_v52  ;;  %v447_v60 = vmul.u32.u64.low %v175_v53, %v170_v56  ;;  %v448_v61 = vmul.u32.u64.high %v175_v53, %v170_v56, %v447_v60  ;;  %v182_v0 = vmul.u32 %v175_v53, %v166_v62 }
 0x11d   :  { %v444_v58 = vmul.u32.u64.low %v175_v53, %v174_v57  ;;  %v445_v59 = vmul.u32.u64.high %v175_v53, %v174_v57, %v444_v58 }
 0x11e   :  { %v185_v63 = vadd.s32 1, %v448_v61 }
 0x11f   :  { %vm184_vm7 = vc.u32 %v445_v59, %v447_v60  ;;  %v183_v13 = vadd.s32 %v447_v60, %v445_v59 }
 0x120   :  { %v186_v1 = vsel %vm184_vm7, %v185_v63, %v448_v61 }
 0x121   :  { %v187_v2 = vadd.s32 %v186_v1, %v182_v0 }
 0x123   :  { %v188_v3 = vadd.s32 536870912, %v187_v2 }
 0x125   :  { %v189_v4 = vshrl.u32 %v188_v3, 30 }
 0x127   :  { %v190_v5 = vshll.u32 %v189_v4, 30  ;;  %v213_v26 = vsub.s32 4, %v189_v4 }
 0x129   :  { %v191_v6 = vsub.s32 %v187_v2, %v190_v5  ;;  %v214_v29 = vsel %vm129_vm9, %v213_v26, %v189_v4 }
 0x12a   :  { %v216_v31 = vsel %vm128_vm10, 0, %v214_v29 }
 0x12b   :  { %v193_v7 = vsub.s32 0, %v191_v6  ;;  %v220_v32 = vadd.s32 3, %v216_v31 }
 0x12d   :  { %v251_v8 = vmin.u32 %v193_v7, %v191_v6  ;;  %v221_v33 = vand.u32 3, %v220_v32 }
 0x12f   :  { %v195_v9 = vclz %v251_v8  ;;  %vm226_vm11 = vcmp.eq.s32.totalorder %v221_v33, 2  ;;  %vm223_vm12 = vcmp.eq.s32.totalorder %v221_v33, 0  ;;  %vm222_vm13 = vcmp.lt.s32.totalorder %v221_v33, 2 }
 0x131   :  { %v252_v10 = vadd.s32 4294967294, %v195_v9 }
 0x133   :  { %vm253_vm8 = vcmp.lt.s32.totalorder %v252_v10, 0 }
 0x134   :  { %v198_v12 = vsel %vm253_vm8, 0, %v252_v10 }
 0x135   :  { %v199_v14 = vsub.s32 32, %v198_v12  ;;  %v203_v15 = vsub.s32 4294967266, %v198_v12  ;;  %v200_v16 = vshll.u32 %v191_v6, %v198_v12 }
 0x137   :  { %v201_v18 = vshrl.u32 %v183_v13, %v199_v14  ;;  %v204_v19 = vadd.s32 127, %v203_v15 }
 0x139   :  { %v202_v20 = vor.u32 %v201_v18, %v200_v16  ;;  %v205_v21 = vshll.u32 %v204_v19, 23 }
 0x13b   :  { %v206_v22 = vor.u32 4788187, %v205_v21  ;;  %v209_v24 = vcvt.s32.f32 %v202_v20 }
 0x13d   :  { %v207_v23 = vand.u32 2147483647, %v206_v22 }
 0x13f   :  { %v210_v25 = vmul.f32 %v209_v24, %v207_v23 }
 0x141   :  { %v211_v27 = vxor.u32 2147483648, %v210_v25 }
 0x143   :  { %v212_v28 = vsel %vm129_vm9, %v211_v27, %v210_v25 }
 0x144   :  { %v215_v30 = vsel %vm128_vm10, %v438_v11, %v212_v28 }
 0x145   :  { %294 = vcosq.f32 %v215_v30 }
 0x146   :  { %296 = vsinq.f32 %v215_v30 }
 0x14f   :  { %v295_v34 = vpop.eup %294 }
 0x150   :  { %v297_v35 = vpop.eup %296  ;;  %v227_v36 = vxor.u32 2147483648, %v295_v34 }
 0x151   :  { %v224_v37 = vxor.u32 2147483648, %v297_v35 }
 0x152   :  { %v228_v38 = vsel %vm226_vm11, %v227_v36, %v297_v35 }
 0x153   :  { %v225_v39 = vsel %vm223_vm12, %v295_v34, %v224_v37 }
 0x154   :  { %v229_v17 = vsel %vm222_vm13, %v225_v39, %v228_v38 }
 0x155   :  { %v230_v40 = vsel %vm219_vm14, nan, %v229_v17 }
 0x156   :  { %231 = vst [vmem:[#allocation7] sm:$0xff] %v230_v40 }
 0x157   :  { %353 = shalt.err (!%p350_p6)
}
 0x158   :  { %s354_s15 = scalar_lea.hbm %s474_s3, 128 }
 0x159   :  { %p355_p7 = scmp.ne.s32.totalorder %s474_s3, %s354_s15  ;;  %p358_p8 = scmp.lt.u32.totalorder %s354_s15, %s474_s3 }
 0x15b   :  { %p360_p9 = pnand %p358_p8, %p355_p7 }
 0x15d   :  { %363 = shalt.err (!%p360_p9)
}
 0x15e   :  { %241 = dma.vmem_to_hbm [thread:$0]  %s239_s11, 128, %s474_s3, [#allocation4]  }
 0x15f   :  { %368 = dma.done.wait [#allocation4], 128  }
 0x160   :  { %369 = vsyncadd [#allocation4], 4294967168 }
 0x161   :  { %245 = vsyncpa [#allocation3], 1 }
 0x162   :  { %246 = vsyncpa [#allocation6], 1 }
 0x163   :  { %247 = vsyncpa [#allocation4], 1 }

</bundles_post_ra>
